<compile_context>
chip_gen: v7x
topology: tpu7x:2x2x1
jax: 0.10.0
libtpu: 0.0.40
codegen_flags: <defaults>
</compile_context>

<pallas_src>
import jax
import jax.numpy as jnp
from jax.experimental import pallas as pl
from jax.experimental.pallas import tpu as pltpu


def _lstm_layer_kernel(x_ref, h0_ref, c0_ref, wih_ref, whh_ref, b_ref,
                       y_ref, h_scr, c_scr):
    """One timestep of an LSTM layer. Grid axis 0 = time (sequential)."""
    t = pl.program_id(0)

    @pl.when(t == 0)
    def _():
        h_scr[...] = h0_ref[...].astype(jnp.float32)
        c_scr[...] = c0_ref[...].astype(jnp.float32)

    x = x_ref[0].astype(jnp.float32)        # (B, D)
    h = h_scr[...]                          # (B, H)
    c = c_scr[...]                          # (B, H)

    # gates = x @ W_ih^T + h @ W_hh^T + b   -> (B, 4H) on the MXU, f32 accum.
    gates = (jnp.dot(x, wih_ref[...], preferred_element_type=jnp.float32)
             + jnp.dot(h, whh_ref[...], preferred_element_type=jnp.float32)
             + b_ref[...].astype(jnp.float32))

    hid = h_scr.shape[-1]
    i = jax.nn.sigmoid(gates[:, 0 * hid:1 * hid])
    f = jax.nn.sigmoid(gates[:, 1 * hid:2 * hid])
    g = jnp.tanh(gates[:, 2 * hid:3 * hid])
    o = jax.nn.sigmoid(gates[:, 3 * hid:4 * hid])

    c_new = f * c + i * g
    h_new = o * jnp.tanh(c_new)

    c_scr[...] = c_new
    h_scr[...] = h_new
    y_ref[0] = h_new.astype(y_ref.dtype)


def lstm_layer_forward(x_seq, h0, c0, w_ih_t, w_hh_t, bias_row):
    """Run one LSTM layer over the whole sequence.

    x_seq:    (T, B, D) f32
    h0, c0:   (B, H)    f32
    w_ih_t:   (D, 4H)   f32   (transposed torch weight_ih)
    w_hh_t:   (H, 4H)   f32   (transposed torch weight_hh)
    bias_row: (1, 4H)   f32
    returns:  (T, B, H) f32   (h_t for every timestep)
    """
    T, B, D = x_seq.shape
    H = c0.shape[-1]
    assert h0.shape == (B, H)
    assert w_ih_t.shape == (D, 4 * H)
    assert w_hh_t.shape == (H, 4 * H)
    assert bias_row.shape == (1, 4 * H)

    return pl.pallas_call(
        _lstm_layer_kernel,
        out_shape=jax.ShapeDtypeStruct((T, B, H), jnp.float32),
        grid_spec=pltpu.PrefetchScalarGridSpec(
            num_scalar_prefetch=0,
            grid=(T,),
            in_specs=[
                pl.BlockSpec((1, B, D), lambda t: (t, 0, 0)),   # x_t
                pl.BlockSpec((B, H), lambda t: (0, 0)),          # h0
                pl.BlockSpec((B, H), lambda t: (0, 0)),          # c0
                pl.BlockSpec((D, 4 * H), lambda t: (0, 0)),      # W_ih^T (VMEM-resident)
                pl.BlockSpec((H, 4 * H), lambda t: (0, 0)),      # W_hh^T (VMEM-resident)
                pl.BlockSpec((1, 4 * H), lambda t: (0, 0)),      # bias
            ],
            out_specs=pl.BlockSpec((1, B, H), lambda t: (t, 0, 0)),
            scratch_shapes=[
                pltpu.VMEM((B, H), jnp.float32),   # h state (persists across steps)
                pltpu.VMEM((B, H), jnp.float32),   # c state (persists across steps)
            ],
        ),
        compiler_params=pltpu.CompilerParams(
            # Time axis is a true recurrence -> must be sequential.
            dimension_semantics=("arbitrary",),
            # Safe on every generation (v5e default scoped 16 MiB is raised;
            # well under v7x's 64 MiB physical VMEM).
            vmem_limit_bytes=32 * 1024 * 1024,
        ),
    )(x_seq, h0, c0, w_ih_t, w_hh_t, bias_row)


def _kaiming_uniform(key, shape):
    # torch.nn.init.kaiming_uniform_ default: bound = sqrt(6 / fan_in),
    # fan_in = shape[1] for an (out, in) weight.
    fan_in = shape[1]
    bound = (6.0 / fan_in) ** 0.5
    return jax.random.uniform(key, shape, jnp.float32, minval=-bound, maxval=bound)


class MultiLayerLSTM:
    """JAX/Pallas port of the PyTorch MultiLayerLSTM forward pass."""

    def __init__(self, input_size, hidden_size, n_layer=1, bidirectional=False,
                 dropout_x=0.0, dropout_h=0.0, *, key):
        if bidirectional:
            # TODO(synk): bidirectional path not implemented (for n_layer>1 the
            # torch module hits its non-deterministic nn.Linear shape-fix hack).
            raise NotImplementedError("only bidirectional=False is supported")
        self.input_size = input_size
        self.hidden_size = hidden_size
        self.n_layer = n_layer
        # TODO(synk): training-time dropout_x / dropout_h (F.dropout) not implemented;
        # this is the inference forward pass (dropout defaults to 0.0 anyway).
        self.dropout_x = dropout_x
        self.dropout_h = dropout_h

        self.params = []   # per layer: (w_ih_t, w_hh_t, bias_row)
        in_sizes = [input_size] + [hidden_size] * (n_layer - 1)
        keys = jax.random.split(key, 2 * n_layer)
        for l, d_in in enumerate(in_sizes):
            w_ih = _kaiming_uniform(keys[2 * l], (4 * hidden_size, d_in))
            w_hh = _kaiming_uniform(keys[2 * l + 1], (4 * hidden_size, hidden_size))
            bias = jnp.zeros((4 * hidden_size,), jnp.float32)
            self.params.append(
                (jnp.asarray(w_ih.T), jnp.asarray(w_hh.T), bias.reshape(1, -1)))

    def __call__(self, inputs, hx=None, cx=None):
        return self.forward(inputs, hx, cx)

    def forward(self, inputs, hx=None, cx=None):
        # The torch module iterates `inputs` over its leading axis: accept a
        # list of (B, D) arrays or a stacked (T, B, D) array.
        if isinstance(inputs, (list, tuple)):
            x_seq = jnp.stack([jnp.asarray(x) for x in inputs], axis=0)
        else:
            x_seq = jnp.asarray(inputs)
        x_seq = x_seq.astype(jnp.float32)
        T, B, _ = x_seq.shape
        H = self.hidden_size

        for (w_ih_t, w_hh_t, bias_row) in self.params:
            d_in = x_seq.shape[-1]
            if hx is None:
                # torch quirk: h0 = ones with the shape of the timestep input.
                if d_in != H:
                    # TODO(synk): torch falls back to a freshly-initialized nn.Linear
                    # here (new random weights every call, non-deterministic) -- not
                    # translatable; requires input_size == hidden_size when hx is None.
                    raise NotImplementedError(
                        "requires input_size == hidden_size when hx is None")
                h0 = jnp.ones((B, d_in), jnp.float32)
            else:
                h0 = jnp.asarray(hx, jnp.float32)
                if h0.shape != (B, H):
                    raise NotImplementedError("hx must have shape (batch, hidden)")
            c0 = (jnp.zeros((B, H), jnp.float32) if cx is None
                  else jnp.asarray(cx, jnp.float32))
            x_seq = lstm_layer_forward(x_seq, h0, c0, w_ih_t, w_hh_t, bias_row)

        # The torch forward returns a python list of per-timestep outputs.
        return [x_seq[t] for t in range(T)]


def _ref_forward(model, inputs, hx=None, cx=None):
    """Pure-JAX reference with identical semantics (for correctness check)."""
    x_seq = jnp.asarray(inputs, jnp.float32)
    T, B, _ = x_seq.shape
    H = model.hidden_size
    for (w_ih_t, w_hh_t, bias_row) in model.params:
        h = jnp.ones((B, x_seq.shape[-1]), jnp.float32) if hx is None else jnp.asarray(hx)
        c = jnp.zeros((B, H), jnp.float32) if cx is None else jnp.asarray(cx)
        outs = []
        for t in range(T):
            gates = x_seq[t] @ w_ih_t + h @ w_hh_t + bias_row[0]
            i = jax.nn.sigmoid(gates[:, :H])
            f = jax.nn.sigmoid(gates[:, H:2 * H])
            g = jnp.tanh(gates[:, 2 * H:3 * H])
            o = jax.nn.sigmoid(gates[:, 3 * H:])
            c = f * c + i * g
            h = o * jnp.tanh(c)
            outs.append(h)
        x_seq = jnp.stack(outs, axis=0)
    return x_seq


if __name__ == "__main__":
    key = jax.random.PRNGKey(0)
    k_x, k_m = jax.random.split(key)

    # Shapes chosen so the torch module's standard path is exercised
    # (batch == input_size == hidden_size avoids its random nn.Linear hack).
    batch, seq, hidden = 32, 8, 32
    input_size, n_layer = hidden, 2

    x_seq = jax.random.normal(k_x, (seq, batch, input_size), dtype=jnp.float32)

    model = MultiLayerLSTM(input_size, hidden, n_layer=n_layer, key=k_m)

    # Stacked-array input path.
    outs = model(x_seq)
    outs = [jax.block_until_ready(o) for o in outs]

    # List-of-timesteps input path (matches how the torch module iterates).
    outs_list = model([x_seq[t] for t in range(seq)])
    outs_list = [jax.block_until_ready(o) for o in outs_list]

    # Correctness vs. pure-JAX reference.
    y = jnp.stack(outs, axis=0)
    ref = _ref_forward(model, x_seq)
    assert y.shape == (seq, batch, hidden)
    max_err = float(jnp.max(jnp.abs(y - ref)))
    assert jnp.allclose(y, ref, atol=1e-2, rtol=1e-2), f"mismatch vs reference, max abs diff {max_err}"
    y2 = jnp.stack(outs_list, axis=0)
    assert jnp.allclose(y2, ref, atol=1e-2, rtol=1e-2), "mismatch vs reference (list input)"

    print("KERNEL_OK")
</pallas_src>

<mosaic_0001>
module attributes {stable_mosaic.version = 11 : i64} {
  func.func @_lstm_layer_kernel(%arg0: i32, %arg1: memref<1x32x32xf32, #tpu.memory_space<vmem>>, %arg2: memref<32x32xf32, #tpu.memory_space<vmem>>, %arg3: memref<32x32xf32, #tpu.memory_space<vmem>>, %arg4: memref<32x128xf32, #tpu.memory_space<vmem>>, %arg5: memref<32x128xf32, #tpu.memory_space<vmem>>, %arg6: memref<1x128xf32, #tpu.memory_space<vmem>>, %arg7: memref<1x32x32xf32, #tpu.memory_space<vmem>>, %arg8: memref<32x32xf32, #tpu.memory_space<vmem>>, %arg9: memref<32x32xf32, #tpu.memory_space<vmem>>) attributes {dimension_semantics = [#tpu.dimension_semantics<arbitrary>], iteration_bounds = array<i64: 8>, scalar_prefetch = 0 : i64, scratch_operands = 2 : i64, tpu.core_type = #tpu.core_type<tc>, window_params = [{transform_indices = @transform_0, window_bounds = array<i64: 1, 32, 32>}, {pipeline_mode = #tpu.pipeline_mode<synchronous>, transform_indices = @transform_1, window_bounds = array<i64: 32, 32>}, {pipeline_mode = #tpu.pipeline_mode<synchronous>, transform_indices = @transform_2, window_bounds = array<i64: 32, 32>}, {pipeline_mode = #tpu.pipeline_mode<synchronous>, transform_indices = @transform_3, window_bounds = array<i64: 32, 128>}, {pipeline_mode = #tpu.pipeline_mode<synchronous>, transform_indices = @transform_4, window_bounds = array<i64: 32, 128>}, {pipeline_mode = #tpu.pipeline_mode<synchronous>, transform_indices = @transform_5, window_bounds = array<i64: 1, 128>}, {transform_indices = @transform_6, window_bounds = array<i64: 1, 32, 32>}]} {
    %c0_i32 = arith.constant 0 : i32
    %0 = arith.cmpi eq, %arg0, %c0_i32 : i32
    %1 = arith.extui %0 : i1 to i32
    %c0_i32_0 = arith.constant 0 : i32
    %2 = arith.cmpi ne, %1, %c0_i32_0 : i32
    scf.if %2 {
      %c0_24 = arith.constant 0 : index
      %c0_25 = arith.constant 0 : index
      %45 = vector.load %arg2[%c0_24, %c0_25] : memref<32x32xf32, #tpu.memory_space<vmem>>, vector<32x32xf32>
      %c0_26 = arith.constant 0 : index
      %c0_27 = arith.constant 0 : index
      %46 = vector.load %arg8[%c0_26, %c0_27] : memref<32x32xf32, #tpu.memory_space<vmem>>, vector<32x32xf32>
      tpu.vector_store %arg8[%c0_26, %c0_27], %45 {strides = array<i32>} : memref<32x32xf32, #tpu.memory_space<vmem>>, vector<32x32xf32>,
      %c0_28 = arith.constant 0 : index
      %c0_29 = arith.constant 0 : index
      %47 = vector.load %arg3[%c0_28, %c0_29] : memref<32x32xf32, #tpu.memory_space<vmem>>, vector<32x32xf32>
      %c0_30 = arith.constant 0 : index
      %c0_31 = arith.constant 0 : index
      %48 = vector.load %arg9[%c0_30, %c0_31] : memref<32x32xf32, #tpu.memory_space<vmem>>, vector<32x32xf32>
      tpu.vector_store %arg9[%c0_30, %c0_31], %47 {strides = array<i32>} : memref<32x32xf32, #tpu.memory_space<vmem>>, vector<32x32xf32>,
    } else {
    }
    %c0 = arith.constant 0 : index
    %c0_1 = arith.constant 0 : index
    %c0_2 = arith.constant 0 : index
    %3 = vector.load %arg1[%c0, %c0_1, %c0_2] : memref<1x32x32xf32, #tpu.memory_space<vmem>>, vector<1x32x32xf32>
    %4 = vector.shape_cast %3 : vector<1x32x32xf32> to vector<32x32xf32>
    %c0_3 = arith.constant 0 : index
    %c0_4 = arith.constant 0 : index
    %5 = vector.load %arg8[%c0_3, %c0_4] : memref<32x32xf32, #tpu.memory_space<vmem>>, vector<32x32xf32>
    %c0_5 = arith.constant 0 : index
    %c0_6 = arith.constant 0 : index
    %6 = vector.load %arg9[%c0_5, %c0_6] : memref<32x32xf32, #tpu.memory_space<vmem>>, vector<32x32xf32>
    %c0_7 = arith.constant 0 : index
    %c0_8 = arith.constant 0 : index
    %7 = vector.load %arg4[%c0_7, %c0_8] : memref<32x128xf32, #tpu.memory_space<vmem>>, vector<32x128xf32>
    %cst = arith.constant dense<0.000000e+00> : vector<32x128xf32>
    %8 = tpu.matmul %4, %7, %cst {dimension_numbers = #tpu.dot_dimension_numbers<[1], [0], [0], [1], [0, 0, 1, 1], [], []>} : vector<32x32xf32>, vector<32x128xf32>, vector<32x128xf32> -> vector<32x128xf32>
    %c0_9 = arith.constant 0 : index
    %c0_10 = arith.constant 0 : index
    %9 = vector.load %arg5[%c0_9, %c0_10] : memref<32x128xf32, #tpu.memory_space<vmem>>, vector<32x128xf32>
    %cst_11 = arith.constant dense<0.000000e+00> : vector<32x128xf32>
    %10 = tpu.matmul %5, %9, %cst_11 {dimension_numbers = #tpu.dot_dimension_numbers<[1], [0], [0], [1], [0, 0, 1, 1], [], []>} : vector<32x32xf32>, vector<32x128xf32>, vector<32x128xf32> -> vector<32x128xf32>
    %11 = arith.addf %8, %10 : vector<32x128xf32>
    %c0_12 = arith.constant 0 : index
    %c0_13 = arith.constant 0 : index
    %12 = vector.load %arg6[%c0_12, %c0_13] : memref<1x128xf32, #tpu.memory_space<vmem>>, vector<1x128xf32>
    %13 = vector.broadcast %12 : vector<1x128xf32> to vector<32x128xf32>
    %14 = arith.addf %11, %13 : vector<32x128xf32>
    %15 = vector.extract_strided_slice %14 {offsets = [0, 0], sizes = [32, 32], strides = [1, 1]} : vector<32x128xf32> to vector<32x32xf32>
    %16 = arith.negf %15 : vector<32x32xf32>
    %17 = math.exp %16 : vector<32x32xf32>
    %cst_14 = arith.constant 1.000000e+00 : f32
    %18 = vector.broadcast %cst_14 : f32 to vector<32x32xf32>
    %19 = arith.addf %18, %17 : vector<32x32xf32>
    %20 = arith.divf %18, %19 : vector<32x32xf32>
    %21 = vector.extract_strided_slice %14 {offsets = [0, 32], sizes = [32, 32], strides = [1, 1]} : vector<32x128xf32> to vector<32x32xf32>
    %22 = arith.negf %21 : vector<32x32xf32>
    %23 = math.exp %22 : vector<32x32xf32>
    %cst_15 = arith.constant 1.000000e+00 : f32
    %24 = vector.broadcast %cst_15 : f32 to vector<32x32xf32>
    %25 = arith.addf %24, %23 : vector<32x32xf32>
    %26 = arith.divf %24, %25 : vector<32x32xf32>
    %27 = vector.extract_strided_slice %14 {offsets = [0, 64], sizes = [32, 32], strides = [1, 1]} : vector<32x128xf32> to vector<32x32xf32>
    %28 = math.tanh %27 : vector<32x32xf32>
    %29 = vector.extract_strided_slice %14 {offsets = [0, 96], sizes = [32, 32], strides = [1, 1]} : vector<32x128xf32> to vector<32x32xf32>
    %30 = arith.negf %29 : vector<32x32xf32>
    %31 = math.exp %30 : vector<32x32xf32>
    %cst_16 = arith.constant 1.000000e+00 : f32
    %32 = vector.broadcast %cst_16 : f32 to vector<32x32xf32>
    %33 = arith.addf %32, %31 : vector<32x32xf32>
    %34 = arith.divf %32, %33 : vector<32x32xf32>
    %35 = arith.mulf %26, %6 : vector<32x32xf32>
    %36 = arith.mulf %20, %28 : vector<32x32xf32>
    %37 = arith.addf %35, %36 : vector<32x32xf32>
    %38 = math.tanh %37 : vector<32x32xf32>
    %39 = arith.mulf %34, %38 : vector<32x32xf32>
    %c0_17 = arith.constant 0 : index
    %c0_18 = arith.constant 0 : index
    %40 = vector.load %arg9[%c0_17, %c0_18] : memref<32x32xf32, #tpu.memory_space<vmem>>, vector<32x32xf32>
    tpu.vector_store %arg9[%c0_17, %c0_18], %37 {strides = array<i32>} : memref<32x32xf32, #tpu.memory_space<vmem>>, vector<32x32xf32>,
    %c0_19 = arith.constant 0 : index
    %c0_20 = arith.constant 0 : index
    %41 = vector.load %arg8[%c0_19, %c0_20] : memref<32x32xf32, #tpu.memory_space<vmem>>, vector<32x32xf32>
    tpu.vector_store %arg8[%c0_19, %c0_20], %39 {strides = array<i32>} : memref<32x32xf32, #tpu.memory_space<vmem>>, vector<32x32xf32>,
    %c0_21 = arith.constant 0 : index
    %c0_22 = arith.constant 0 : index
    %c0_23 = arith.constant 0 : index
    %42 = vector.load %arg7[%c0_21, %c0_22, %c0_23] : memref<1x32x32xf32, #tpu.memory_space<vmem>>, vector<1x32x32xf32>
    %43 = vector.shape_cast %42 : vector<1x32x32xf32> to vector<32x32xf32>
    %44 = vector.shape_cast %39 : vector<32x32xf32> to vector<1x32x32xf32>
    tpu.vector_store %arg7[%c0_21, %c0_22, %c0_23], %44 {strides = array<i32>} : memref<1x32x32xf32, #tpu.memory_space<vmem>>, vector<1x32x32xf32>,
    return
  }
  func.func @transform_0(%arg0: i32) -> (i32, i32, i32) {
    %c0_i32 = arith.constant 0 : i32
    %c0_i32_0 = arith.constant 0 : i32
    %c0_i32_1 = arith.constant 0 : i32
    return %arg0, %c0_i32, %c0_i32_0 : i32, i32, i32
  }
  func.func @transform_1(%arg0: i32) -> (i32, i32) {
    %c0_i32 = arith.constant 0 : i32
    %c0_i32_0 = arith.constant 0 : i32
    %c0_i32_1 = arith.constant 0 : i32
    return %c0_i32, %c0_i32_0 : i32, i32
  }
  func.func @transform_2(%arg0: i32) -> (i32, i32) {
    %c0_i32 = arith.constant 0 : i32
    %c0_i32_0 = arith.constant 0 : i32
    %c0_i32_1 = arith.constant 0 : i32
    return %c0_i32, %c0_i32_0 : i32, i32
  }
  func.func @transform_3(%arg0: i32) -> (i32, i32) {
    %c0_i32 = arith.constant 0 : i32
    %c0_i32_0 = arith.constant 0 : i32
    %c0_i32_1 = arith.constant 0 : i32
    return %c0_i32, %c0_i32_0 : i32, i32
  }
  func.func @transform_4(%arg0: i32) -> (i32, i32) {
    %c0_i32 = arith.constant 0 : i32
    %c0_i32_0 = arith.constant 0 : i32
    %c0_i32_1 = arith.constant 0 : i32
    return %c0_i32, %c0_i32_0 : i32, i32
  }
  func.func @transform_5(%arg0: i32) -> (i32, i32) {
    %c0_i32 = arith.constant 0 : i32
    %c0_i32_0 = arith.constant 0 : i32
    %c0_i32_1 = arith.constant 0 : i32
    return %c0_i32, %c0_i32_0 : i32, i32
  }
  func.func @transform_6(%arg0: i32) -> (i32, i32, i32) {
    %c0_i32 = arith.constant 0 : i32
    %c0_i32_0 = arith.constant 0 : i32
    %c0_i32_1 = arith.constant 0 : i32
    return %arg0, %c0_i32, %c0_i32_0 : i32, i32, i32
  }
}

</mosaic_0001>

<bundles_post_ra>
// kernel: tpu_custom_call.1
= control target key start
LH: loop header
LB: loop body
LE: loop exit
PB: predicated region body
PF: predicated region fallthrough
CT: control target
= control target key end

     0   :  { %11 = vsyncpa [#allocation5], 0  ;;  %s1699_s0 = inlined_call_operand.hbm [shape: f32[8,32,32], index: 0, kind: input, shape index: {}]   ;;  %s1700_s1 = inlined_call_operand.hbm [shape: f32[32,32], index: 1, kind: input, shape index: {}]   ;;  %s1701_s2 = inlined_call_operand.hbm [shape: f32[32,32], index: 2, kind: input, shape index: {}]   ;;  %s1702_s3 = inlined_call_operand.hbm [shape: f32[32,128], index: 3, kind: input, shape index: {}]   ;;  %s1703_s4 = inlined_call_operand.hbm [shape: f32[32,128], index: 4, kind: input, shape index: {}]   ;;  %s1704_s5 = inlined_call_operand.vmem [shape: f32[1,128], index: 5, kind: input, shape index: {}]   ;;  %s1705_s6 = inlined_call_operand.hbm [shape: f32[8,32,32], index: 6, kind: output, shape index: {}]  }
   0x1   :  { %13 = vsyncpa [#allocation5 + $0x1], 0 }
   0x2   :  { %14 = vsyncpa [#allocation8], 0 }
   0x3   :  { %15 = vsyncpa [#allocation11], 0 }
   0x4   :  { %16 = vsyncpa [#allocation6], 0 }
   0x5   :  { %18 = vsyncpa [#allocation6 + $0x1], 0  ;;  %s1350_s21 = smov 0   ;;  %s1352_s22 = smov 0  }
   0x6   :  { %s1354_s23 = smov 0   ;;  %s1356_s24 = smov 0  }
   0x7 LB: > { %s1371_s25 = sadd.s32 4294967295, %s1300_s24   ;;  %s856_s26 = sadd.s32 4294967294, %s1300_s24   ;;  %s1300_s24 = sphi %s1356_s24, %s1728_s24   ;;  %s1296_s23 = sphi %s1354_s23, %s1727_s23   ;;  %s1292_s22 = sphi %s1352_s22, %s1726_s22   ;;  %s1288_s21 = sphi %s1350_s21, %s1725_s21  }
   0x8   : > { %p44_p0 = scmp.ne.s32.totalorder %s1292_s22, %s1288_s21  ;;  %p1706_p1 = scmp.eq.s32.totalorder %s1371_s25, 0 }
   0x9   : > { %p179_p3 = scmp.eq.s32.totalorder %s856_s26, 7  ;;  %p857_p5 = scmp.ge.s32.totalorder %s1300_s24, 1 }
   0xa   : > { %p1380_p4 = por %p1706_p1, %p44_p0  ;;  %p186_p7 = scmp.lt.s32.totalorder %s1300_s24, 9 }
   0xb   : > { %p1385_p6 = por %p179_p3, %p44_p0  ;;  %s1302_s30 = smov [#allocation7]  }
   0xc   : > { %s1709_s27 = scalar_select %p1380_p4, 1, 0 }
   0xd   : > { %s1710_s28 = scalar_select %p1385_p6, 1, 0 }
   0xe   : > { %p1391_p9 = pnand %p857_p5, %p186_p7  ;;  %s198_s7 = sshll.u32 %s1302_s30, 4  ;;  %s1395_s7 = int_to_ptr.vmem [resolvable:$true] %s198_s7 }
   0xf   : > { %s1303_s9 = smov [#allocation10]   ;;  %s1304_s11 = smov [#allocation9]  }
  0x10   : > { %s1711_s29 = scalar_select %p1391_p9, 1, 0 }
  0x11   : > { %p978_p10 = pneg %p1391_p9  ;;  %s224_s10 = sshll.u32 %s1303_s9, 4  ;;  %s1405_s10 = int_to_ptr.vmem [resolvable:$true] %s224_s10 }
  0x12   : > { %s1407_s12 = sshll.u32 %s1304_s11, 4  ;;  %s1084_s15 = scalar_lea.hbm %s1700_s1, 512  ;;  %s212_s12 = int_to_ptr.vmem [resolvable:$true] %s1407_s12 }
  0x13   : > { %p1401_p11 = pnand %p978_p10, %p1706_p1  ;;  %p1085_p12 = scmp.ne.s32.totalorder %s1700_s1, %s1084_s15 }
  0x14   : > { %p1091_p5 = scmp.lt.u32.totalorder %s1084_s15, %s1700_s1 }
  0x15   : > { %p1417_p13 = pneg %p1401_p11 }
  0x17   : > { %p1087_p0 = pnand %p1417_p13, %p1085_p12 }
  0x19   : > { %p1088_p3 = pneg %p1087_p0 }
  0x1b   : > { %p1093_p7 = pnand %p1091_p5, %p1088_p3 }
  0x1d   : > { %1096 = shalt.err (!%p1093_p7)
}
  0x1e   : > { %s1097_s26 = scalar_lea.vmem %s1395_s7, 512  ;;  %p1105_p2 = scmp.lt.s32.totalorder %s1395_s7, %s1395_s7 }
  0x1f   : > { %p1098_p10 = scmp.ne.s32.totalorder %s1395_s7, %s1097_s26  ;;  %p1106_p6 = scmp.lt.s32.totalorder %s1097_s26, %s1097_s26 }
  0x21   : > { %p1100_p8 = pnand %p1098_p10, %p1417_p13  ;;  %p1107_p12 = por %p1106_p6, %p1105_p2 }
  0x23   : > { %p1101_p1 = pneg %p1100_p8 }
  0x25   : > { %p1108_p0 = pnand %p1107_p12, %p1101_p1 }
  0x27   : > { %1111 = shalt.err (!%p1108_p0)
}
  0x28   : > { %s1305_s30 = smov 128   ;;  %s1306_s9 = smov 8  }
  0x29   : > { %981 = dma.hbm_to_vmem [thread:$0]  (!%p1401_p11), %s1700_s1, 512, %s1395_s7, [#allocation8], %s1305_s30, %s1305_s30, %s1306_s9  }
  0x2a   : > { %s1112_s16 = scalar_lea.hbm %s1702_s3, 512 }
  0x2b   : > { %p1113_p1 = scmp.ne.s32.totalorder %s1702_s3, %s1112_s16  ;;  %p1119_p8 = scmp.lt.u32.totalorder %s1112_s16, %s1702_s3 }
  0x2d   : > { %p1115_p2 = pnand %p1113_p1, %p1417_p13 }
  0x2f   : > { %p1116_p6 = pneg %p1115_p2 }
  0x31   : > { %p1121_p3 = pnand %p1119_p8, %p1116_p6 }
  0x33   : > { %1124 = shalt.err (!%p1121_p3)
}
  0x34   : > { %s1125_s7 = scalar_lea.vmem %s1405_s10, 512  ;;  %p1133_p12 = scmp.lt.s32.totalorder %s1405_s10, %s1405_s10 }
  0x35   : > { %p1126_p5 = scmp.ne.s32.totalorder %s1405_s10, %s1125_s7  ;;  %p1134_p0 = scmp.lt.s32.totalorder %s1125_s7, %s1125_s7 }
  0x37   : > { %p1128_p7 = pnand %p1126_p5, %p1417_p13  ;;  %p1135_p1 = por %p1134_p0, %p1133_p12 }
  0x39   : > { %p1129_p10 = pneg %p1128_p7 }
  0x3b   : > { %p1136_p2 = pnand %p1135_p1, %p1129_p10 }
  0x3d   : > { %1139 = shalt.err (!%p1136_p2)
}
  0x3e   : > { %987 = dma.hbm_to_vmem [thread:$0]  (!%p1401_p11), %s1702_s3, 512, %s1405_s10, [#allocation11], %s1305_s30, %s1305_s30, %s1306_s9  }
  0x3f   : > { %s1140_s16 = scalar_lea.hbm %s1701_s2, 512 }
  0x40   : > { %p1141_p6 = scmp.ne.s32.totalorder %s1701_s2, %s1140_s16  ;;  %p1147_p5 = scmp.lt.u32.totalorder %s1140_s16, %s1701_s2 }
  0x42   : > { %p1143_p8 = pnand %p1141_p6, %p1417_p13 }
  0x44   : > { %p1144_p3 = pneg %p1143_p8 }
  0x46   : > { %p1149_p7 = pnand %p1147_p5, %p1144_p3 }
  0x48   : > { %1152 = shalt.err (!%p1149_p7)
}
  0x49   : > { %s1153_s7 = scalar_lea.vmem %s212_s12, 512  ;;  %p1161_p1 = scmp.lt.s32.totalorder %s212_s12, %s212_s12 }
  0x4a   : > { %p1154_p10 = scmp.ne.s32.totalorder %s212_s12, %s1153_s7  ;;  %p1162_p2 = scmp.lt.s32.totalorder %s1153_s7, %s1153_s7 }
  0x4c   : > { %p1156_p12 = pnand %p1154_p10, %p1417_p13  ;;  %p1163_p4 = por %p1162_p2, %p1161_p1 }
  0x4e   : > { %p1157_p0 = pneg %p1156_p12 }
  0x50   : > { %p1164_p9 = pnand %p1163_p4, %p1157_p0 }
  0x52   : > { %1167 = shalt.err (!%p1164_p9)
}
  0x53   : > { %984 = dma.hbm_to_vmem [thread:$0]  (!%p1401_p11), %s1701_s2, 512, %s212_s12, [#allocation8], %s1305_s30, %s1305_s30, %s1306_s9  }
  0x54   : > { %s1307_s13 = smov [#allocation12]   ;;  %s1168_s17 = scalar_lea.hbm %s1703_s4, 512 }
  0x55   : > { %s237_s14 = sshll.u32 %s1307_s13, 4  ;;  %p1169_p4 = scmp.ne.s32.totalorder %s1703_s4, %s1168_s17  ;;  %s238_s14 = int_to_ptr.vmem [resolvable:$true] %s237_s14 }
  0x56   : > { %p1175_p8 = scmp.lt.u32.totalorder %s1168_s17, %s1703_s4 }
  0x57   : > { %p1171_p9 = pnand %p1169_p4, %p1417_p13 }
  0x59   : > { %p1172_p6 = pneg %p1171_p9 }
  0x5b   : > { %p1177_p3 = pnand %p1175_p8, %p1172_p6 }
  0x5d   : > { %1180 = shalt.err (!%p1177_p3)
}
  0x5e   : > { %s1181_s12 = scalar_lea.vmem %s238_s14, 512  ;;  %p1189_p12 = scmp.lt.s32.totalorder %s238_s14, %s238_s14 }
  0x5f   : > { %p1182_p5 = scmp.ne.s32.totalorder %s238_s14, %s1181_s12  ;;  %p1190_p0 = scmp.lt.s32.totalorder %s1181_s12, %s1181_s12 }
  0x61   : > { %p1184_p7 = pnand %p1182_p5, %p1417_p13  ;;  %p1191_p1 = por %p1190_p0, %p1189_p12 }
  0x63   : > { %p1185_p10 = pneg %p1184_p7 }
  0x65   : > { %p1192_p2 = pnand %p1191_p1, %p1185_p10 }
  0x67   : > { %1195 = shalt.err (!%p1192_p2)
}
  0x68   : > { %990 = dma.hbm_to_vmem [thread:$0]  (!%p1401_p11), %s1703_s4, 512, %s238_s14, [#allocation11], %s1305_s30, %s1305_s30, %s1306_s9  }
  0x69   : > { %s1511_s18 = sadd.s32 1, %s1300_s24   ;;  %s31_s8 = sadd.s32 1, %s1296_s23 }
  0x6a   : > { %s28_s13 = ssub.s32 %s1300_s24, %s1511_s18  ;;  %p38_p13 = scmp.ne.s32.totalorder %s1296_s23, %s1292_s22 }
  0x6b   : > { %p29_p4 = scmp.eq.s32.totalorder %s28_s13, 0  ;;  %p39_p9 = scmp.eq.s32.totalorder %s1300_s24, 0 }
  0x6c   : > { %p1714_p6 = scmp.eq.s32.totalorder %s1371_s25, 7  ;;  %p1003_p3 = scmp.lt.s32.totalorder %s1300_s24, 8 }
  0x6d   : > { %s1527_s16 = scalar_select %p29_p4, %s1296_s23, %s31_s8  }
  0x6e   : > { %p1521_p8 = por %p1714_p6, %p38_p13  ;;  %p40_p5 = por %p39_p9, %p38_p13 }
  0x6f   : > { %s254_s17 = sand.u32 1, %s1296_s23   ;;  %s892_s14 = sshll.u32 %s1300_s24, 9 }
  0x70   : > { %s863_s19 = sshll.u32 %s254_s17, 5  ;;  %s1534_s7 = scalar_lea.hbm %s1699_s0, %s892_s14 }
  0x71   : > { %s258_s12 = scalar_lea.vmem [#allocation4], %s863_s19  ;;  %p1538_p11 = pnand %p1003_p3, %p40_p5 }
  0x72   : > { %s265_s10 = sshll.u32 %s258_s12, 4  ;;  %s1542_s8 = scalar_lea.sflag [#allocation5], %s254_s17  ;;  %s1536_s10 = int_to_ptr.vmem [resolvable:$true] %s265_s10 }
  0x73   : > { %s1196_s13 = scalar_lea.hbm %s1534_s7, 512  ;;  %p1198_p10 = pneg %p1538_p11 }
  0x74   : > { %p1197_p7 = scmp.ne.s32.totalorder %s1534_s7, %s1196_s13  ;;  %s1201_s20 = scalar_lea.hbm %s1699_s0, 4096 }
  0x75   : > { %p1202_p1 = scmp.lt.u32.totalorder %s1534_s7, %s1699_s0  ;;  %p1203_p2 = scmp.lt.u32.totalorder %s1201_s20, %s1196_s13 }
  0x76   : > { %p1199_p12 = pnand %p1198_p10, %p1197_p7  ;;  %p1205_p4 = scmp.lt.u32.totalorder %s1196_s13, %s1534_s7 }
  0x77   : > { %p1204_p13 = por %p1203_p2, %p1202_p1 }
  0x78   : > { %p1200_p0 = pneg %p1199_p12 }
  0x79   : > { %p1206_p9 = por %p1205_p4, %p1204_p13 }
  0x7b   : > { %p1207_p6 = pnand %p1206_p9, %p1200_p0 }
  0x7d   : > { %1210 = shalt.err (!%p1207_p6)
}
  0x7e   : > { %s1211_s17 = scalar_lea.vmem %s1536_s10, 512  ;;  %s1308_s19 = smov [#allocation4]  }
  0x7f   : > { %p1212_p3 = scmp.ne.s32.totalorder %s1536_s10, %s1211_s17  ;;  %s1216_s14 = sshll.u32 %s1308_s19, 4  ;;  %s1217_s14 = int_to_ptr.vmem [resolvable:$false] %s1216_s14 }
  0x80   : > { %s1218_s26 = scalar_lea.vmem %s1217_s14, 1024  ;;  %p1219_p12 = scmp.lt.s32.totalorder %s1536_s10, %s1217_s14 }
  0x81   : > { %p1214_p5 = pnand %p1212_p3, %p1198_p10  ;;  %p1220_p1 = scmp.lt.s32.totalorder %s1218_s26, %s1211_s17 }
  0x83   : > { %p1215_p7 = pneg %p1214_p5  ;;  %p1221_p2 = por %p1220_p1, %p1219_p12 }
  0x85   : > { %p1222_p13 = pnand %p1221_p2, %p1215_p7 }
  0x87   : > { %1225 = shalt.err (!%p1222_p13)
}
  0x88   : > { %994 = dma.hbm_to_vmem [thread:$0]  (!%p1538_p11), %s1534_s7, 512, %s1536_s10, %s1542_s8, %s1305_s30, %s1305_s30, %s1306_s9  }
  0x89   : > { %p1717_p10 = scmp.ne.s32.totalorder %s1711_s29, 0 }
  0x8a   : > { %s1576_s13 = sand.u32 (!%p1717_p10), 1, %s1292_s22   ;;  %p1718_p0 = scmp.ne.s32.totalorder (!%p1717_p10), %s1709_s27, 0 }
  0x8b   : > { %277 = sbr.rel (%p1717_p10) target bundleno = 904 (0x388), region = 44  ;;  %s867_s20 = sshll.u32 (!%p1717_p10), %s1576_s13, 5 }
  0x8c   : > { %s280_s12 = scalar_lea.sflag (!%p1717_p10), [#allocation5], %s1576_s13  ;;  %s1580_s17 = scalar_lea.vmem (!%p1717_p10), [#allocation4], %s867_s20 }
  0x92   : > { %1271 = dma.done.wait (%p1718_p0), %s280_s12, 512  }
  0x93   : > { %1273 = vsyncadd (%p1718_p0), %s280_s12, 4294966784  ;;  %p1719_p11 = scmp.eq.s32.totalorder %s1371_s25, 0 }
  0x95   : > { %1275 = dma.done.wait (%p1719_p11), [#allocation8], 1024   ;;  %p1720_p4 = pmov %p1719_p11 }
  0x97   : > { %1277 = vsyncadd (%p1720_p4), [#allocation8], 4294966272  ;;  %p1721_p9 = pmov %p1720_p4 }
  0x98   : > { %p1722_p6 = pmov %p1720_p4 }
  0x99   : > { %1279 = dma.done.wait (%p1721_p9), [#allocation11], 1024  }
  0x9a   : > { %1281 = vsyncadd (%p1722_p6), [#allocation11], 4294966272  ;;  %s1594_s29 = scalar_lea.vmem [#allocation13], %s867_s20  ;;  %p1723_p3 = scmp.ne.s32.totalorder %s1371_s25, 0 }
  0x9b   : > { %v332_v0 = vld [vmem:[#allocation7] sm:$0xff] (!%p1723_p3)  ;;  %vm336_vm0 = vcmask (!%p1723_p3), 261120   ;;  %v333_v1 = vld [vmem:[#allocation7 + $0x8] sm:$0xff] (!%p1723_p3)  ;;  %v334_v2 = vld [vmem:[#allocation7 + $0x10] sm:$0xff] (!%p1723_p3) }
  0x9c   : > { %331 = sbr.rel (%p1723_p3) target bundleno = 163 (0xa3), region = 68  ;;  %337 = vst.msk [vmem:[#allocation2] sm:$0xff] (!%p1723_p3), %vm336_vm0, %v332_v0  ;;  %338 = vst.msk [vmem:[#allocation2 + $0x8] sm:$0xff] (!%p1723_p3), %vm336_vm0, %v333_v1  ;;  %v335_v3 = vld [vmem:[#allocation7 + $0x18] sm:$0xff] (!%p1723_p3)  ;;  %v341_v4 = vld [vmem:[#allocation9] sm:$0xff] (!%p1723_p3) }
  0x9d   : > { %339 = vst.msk [vmem:[#allocation2 + $0x10] sm:$0xff] (!%p1723_p3), %vm336_vm0, %v334_v2  ;;  %v342_v5 = vld [vmem:[#allocation9 + $0x8] sm:$0xff] (!%p1723_p3)  ;;  %340 = vst.msk [vmem:[#allocation2 + $0x18] sm:$0xff] (!%p1723_p3), %vm336_vm0, %v335_v3  ;;  %v343_v6 = vld [vmem:[#allocation9 + $0x10] sm:$0xff] (!%p1723_p3) }
  0x9e   : > { %345 = vst.msk [vmem:[#allocation3] sm:$0xff] (!%p1723_p3), %vm336_vm0, %v341_v4  ;;  %346 = vst.msk [vmem:[#allocation3 + $0x8] sm:$0xff] (!%p1723_p3), %vm336_vm0, %v342_v5  ;;  %v344_v7 = vld [vmem:[#allocation9 + $0x18] sm:$0xff] (!%p1723_p3) }
  0x9f   : > { %347 = vst.msk [vmem:[#allocation3 + $0x10] sm:$0xff] (!%p1723_p3), %vm336_vm0, %v343_v6  ;;  %348 = vst.msk [vmem:[#allocation3 + $0x18] sm:$0xff] (!%p1723_p3), %vm336_vm0, %v344_v7 }
  0xa3 PF: > { %v365_v8 = vld [vmem:[#allocation12] sm:$0xff]  ;;  %v366_v9 = vld [vmem:[#allocation12 + $0x8] sm:$0xff]  ;;  %vm369_vm1 = vcmask 261120   ;;  %v367_v13 = vld [vmem:[#allocation12 + $0x10] sm:$0xff]  ;;  %s1309_s9 = smov 64   ;;  %s1310_s7 = smov 32  }
  0xa4   : > { %v361_v10 = vld [vmem:[#allocation10] sm:$0xff]  ;;  %v938_v11 = vpack.c.bf16 %v366_v9, %v365_v8  ;;  %v362_v12 = vld [vmem:[#allocation10 + $0x8] sm:$0xff]  ;;  %v368_v14 = vld [vmem:[#allocation12 + $0x18] sm:$0xff]  ;;  %s1311_s10 = smov 96   ;;  %s893_s11 = sshll.u32 %s1371_s25, 9 }
  0xa5   : > { %v946_v15 = vpack.c.bf16 %v362_v12, %v361_v10  ;;  %v942_v16 = vpack.c.bf16 %v368_v14, %v367_v13  ;;  %v363_v17 = vld [vmem:[#allocation10 + $0x10] sm:$0xff]  ;;  %v364_v18 = vld [vmem:[#allocation10 + $0x18] sm:$0xff]  ;;  %v353_v19 = vld [vmem:[#allocation2] sm:$0xff]  ;;  %s745_s8 = sshll.u32 %s1594_s29, 4  ;;  %s1649_s26 = scalar_lea.hbm %s1705_s6, %s893_s11  ;;  %s1651_s8 = int_to_ptr.vmem [resolvable:$true] %s745_s8 }
  0xa6   : > { %939 = vmatprep.subr.bf16.mxu1 %v938_v11  ;;  %v950_v20 = vpack.c.bf16 %v364_v18, %v363_v17  ;;  %918 = vmatprep.mubr.msk.f32.mxu1 %vm369_vm1, %v353_v19  ;;  %v349_v21 = vld [vmem:[%s1580_s17] sm:$0xff]  ;;  %v354_v22 = vld [vmem:[#allocation2 + $0x8] sm:$0xff]  ;;  %v355_v24 = vld [vmem:[#allocation2 + $0x10] sm:$0xff]  ;;  %s732_s25 = scalar_lea.sflag [#allocation6], %s1576_s13  ;;  %s1226_s20 = scalar_lea.vmem %s1651_s8, 512 }
  0xa7   : > { %947 = vmatprep.subr.bf16.mxu0 %v946_v15  ;;  %941 = vmatpush3.bf16.msra.mxu1 %v938_v11  ;;  %v350_v23 = vld [vmem:[%s1580_s17 + $0x8] sm:$0xff]  ;;  %v351_v25 = vld [vmem:[%s1580_s17 + $0x10] sm:$0xff]  ;;  %v356_v26 = vld [vmem:[#allocation2 + $0x18] sm:$0xff]  ;;  %p1227_p5 = scmp.ne.s32.totalorder %s1651_s8, %s1226_s20  ;;  %s1312_s12 = smov [#allocation13]  }
  0xa8   : > { %949 = vmatpush3.bf16.msra.mxu0 %v946_v15  ;;  %943 = vmatprep.subr.bf16.mxu1 %v942_v16  ;;  %v352_v27 = vld [vmem:[%s1580_s17 + $0x18] sm:$0xff]  ;;  %v882_v32 = vld [vmem:[%s1704_s5] ss:$0 sm:$0xff]  ;;  %v358_v50 = vld [vmem:[#allocation3 + $0x8] sm:$0xff]  ;;  %s1230_s17 = sshll.u32 %s1312_s12, 4  ;;  %s1231_s17 = int_to_ptr.vmem [resolvable:$false] %s1230_s17 }
  0xa9   : > { %951 = vmatprep.subr.bf16.mxu0 %v950_v20  ;;  %932 = vmatprep.mubr.msk.f32.mxu0 %vm369_vm1, %v349_v21  ;;  %v357_v48 = vld [vmem:[#allocation3] sm:$0xff]  ;;  %v359_v51 = vld [vmem:[#allocation3 + $0x10] sm:$0xff]  ;;  %v360_v52 = vld [vmem:[#allocation3 + $0x18] sm:$0xff]  ;;  %p1228_p7 = pnand %p1227_p5, %p1521_p8  ;;  %s1232_s27 = scalar_lea.vmem %s1231_s17, 1024 }
  0xaa   : > { %p1233_p1 = scmp.lt.s32.totalorder %s1651_s8, %s1231_s17  ;;  %p1234_p2 = scmp.lt.s32.totalorder %s1232_s27, %s1226_s20 }
  0xab   : > { %945 = vmatpush3.bf16.msra.mxu1 %v942_v16  ;;  %p1229_p12 = pneg %p1228_p7 }
  0xac   : > { %953 = vmatpush3.bf16.msra.mxu0 %v950_v20  ;;  %p1235_p13 = por %p1234_p2, %p1233_p1 }
  0xae   : > { %919 = vmatmul.mubr.msk.f32.vlgmr.msra.gmra.mrb[0].mxu1 %vm369_vm1, %v354_v22  ;;  %p1236_p10 = pnand %p1235_p13, %p1229_p12 }
  0xaf   : > { %933 = vmatmul.mubr.msk.f32.vlgmr.msra.gmra.mrb[0].mxu0 %vm369_vm1, %v350_v23  ;;  %921 = vmatprep.mubr.msk.f32.mxu1 %vm369_vm1, %v355_v24 }
  0xb0   : > { %935 = vmatprep.mubr.msk.f32.mxu0 %vm369_vm1, %v351_v25 }
  0xb2   : > { %922 = vmatmul.mubr.msk.f32.gmra.mrb[2].mxu1 %vm369_vm1, %v356_v26 }
  0xb3   : > { %936 = vmatmul.mubr.msk.f32.gmra.mrb[2].mxu0 %vm369_vm1, %v352_v27 }
 0x181   : > { %v920_v28 = vpop.f32.mrb[0].mxu1 }
 0x182   : > { %v934_v29 = vpop.f32.mrb[0].mxu0  ;;  %v448_v30 = vpop.f32.mrb[1].mxu1 }
 0x183   : > { %v551_v31 = vadd.f32 %v934_v29, %v920_v28  ;;  %v545_v33 = vpop.f32.mrb[1].mxu0 }
 0x184   : > { %v546_v34 = vadd.f32 %v545_v33, %v448_v30 }
 0x185   : > { %v923_v35 = vpop.f32.mrb[2].mxu1  ;;  %v572_v39 = vadd.f32 %v882_v32, %v551_v31 }
 0x186   : > { %v571_v36 = vadd.f32 %v882_v32, %v546_v34  ;;  %v937_v37 = vpop.f32.mrb[2].mxu0  ;;  %v458_v38 = vpop.f32.mrb[3].mxu1 }
 0x187   : > { %v561_v40 = vadd.f32 %v937_v37, %v923_v35  ;;  %v555_v41 = vpop.f32.mrb[3].mxu0  ;;  %v884_v54 = vmul.f32 -1.442695, %v572_v39 }
 0x188   : > { %1052 = vtanh.f32 %v571_v36  ;;  %v556_v42 = vadd.f32 %v555_v41, %v458_v38  ;;  %v883_v53 = vmul.f32 -1.442695, %v571_v36 }
 0x189   : > { %1054 = vtanh.f32 %v572_v39  ;;  %v574_v44 = vadd.f32 %v882_v32, %v561_v40 }
 0x18a   : > { %v573_v43 = vadd.f32 %v882_v32, %v556_v42 }
 0x18b   : > { %v886_v56 = vmul.f32 -1.442695, %v574_v44 }
 0x18c   : > { %1056 = vtanh.f32 %v573_v43  ;;  %v885_v55 = vmul.f32 -1.442695, %v573_v43 }
 0x18d   : > { %1058 = vtanh.f32 %v574_v44 }
 0x18e   : > { %1060 = vpow2.f32 %v883_v53 }
 0x18f   : > { %1062 = vpow2.f32 %v884_v54 }
 0x190   : > { %1064 = vpow2.f32 %v885_v55 }
 0x191   : > { %1066 = vpow2.f32 %v886_v56 }
 0x192   : > { %v1053_v45 = vpop.eup %1052 }
 0x193   : > { %627 = vrot.lane.b32.xlu0 %v1053_v45, %s1309_s9  ;;  %v1055_v46 = vpop.eup %1054 }
 0x196   : > { %v1057_v47 = vpop.eup %1056 }
 0x197   : > { %631 = vrot.lane.b32.xlu1 %v1057_v47, %s1309_s9  ;;  %629 = vrot.lane.b32.xlu0 %v1055_v46, %s1309_s9  ;;  %v1059_v49 = vpop.eup %1058 }
 0x198   : > { %v1061_v57 = vpop.eup %1060 }
 0x199   : > { %v1063_v58 = vpop.eup %1062  ;;  %v587_v59 = vadd.f32 1.0, %v1061_v57 }
 0x19a   : > { %v1065_v60 = vpop.eup %1064  ;;  %v588_v61 = vadd.f32 1.0, %v1063_v58 }
 0x19b   : > { %633 = vrot.lane.b32.xlu1 %v1059_v49, %s1309_s9  ;;  %607 = vrot.lane.b32.xlu0 %v357_v48, %s1310_s7  ;;  %1068 = vrcp.f32 %v587_v59  ;;  %v589_v62 = vadd.f32 1.0, %v1065_v60  ;;  %v1067_v63 = vpop.eup %1066 }
 0x19c   : > { %1070 = vrcp.f32 %v588_v61  ;;  %v590_v0 = vadd.f32 1.0, %v1067_v63 }
 0x19d   : > { %1072 = vrcp.f32 %v589_v62 }
 0x19e   : > { %1074 = vrcp.f32 %v590_v0 }
 0x19f   : > { %609 = vrot.lane.b32.xlu1 %v358_v50, %s1310_s7  ;;  %611 = vrot.lane.b32.xlu0 %v359_v51, %s1310_s7 }
 0x1a3   : > { %613 = vrot.lane.b32.xlu1 %v360_v52, %s1310_s7 }
 0x1a5   : > { %v1069_v1 = vpop.eup %1068 }
 0x1a6   : > { %v1071_v4 = vpop.eup %1070 }
 0x1a7   : > { %v1073_v5 = vpop.eup %1072 }
 0x1a8   : > { %v1075_v10 = vpop.eup %1074 }
 0x205   : > { %v628_v2 = vpop.permute.xlu0 %627 }
 0x206   : > { %v639_v3 = vmul.f32 %v1069_v1, %v628_v2 }
 0x208   : > { %647 = vrot.lane.b32.xlu0 %v639_v3, %s1310_s7 }
 0x209   : > { %v632_v6 = vpop.permute.xlu1 %631  ;;  %v630_v7 = vpop.permute.xlu0 %629 }
 0x20a   : > { %v641_v8 = vmul.f32 %v1073_v5, %v632_v6  ;;  %v640_v9 = vmul.f32 %v1071_v4, %v630_v7 }
 0x20c   : > { %649 = vrot.lane.b32.xlu1 %v640_v9, %s1310_s7  ;;  %651 = vrot.lane.b32.xlu0 %v641_v8, %s1310_s7 }
 0x20d   : > { %v634_v11 = vpop.permute.xlu1 %633  ;;  %v608_v13 = vpop.permute.xlu0 %607 }
 0x20e   : > { %v642_v12 = vmul.f32 %v1075_v10, %v634_v11  ;;  %v619_v16 = vmul.f32 %v1069_v1, %v608_v13 }
 0x210   : > { %653 = vrot.lane.b32.xlu1 %v642_v12, %s1310_s7 }
 0x211   : > { %v610_v14 = vpop.permute.xlu1 %609  ;;  %v612_v15 = vpop.permute.xlu0 %611 }
 0x212   : > { %v620_v20 = vmul.f32 %v1071_v4, %v610_v14  ;;  %v621_v21 = vmul.f32 %v1073_v5, %v612_v15 }
 0x215   : > { %v614_v17 = vpop.permute.xlu1 %613 }
 0x216   : > { %v622_v26 = vmul.f32 %v1075_v10, %v614_v17 }
 0x27a   : > { %v648_v18 = vpop.permute.xlu0 %647 }
 0x27b   : > { %v659_v19 = vadd.f32 %v648_v18, %v619_v16 }
 0x27d   : > { %1076 = vtanh.f32 %v659_v19 }
 0x27e   : > { %v650_v22 = vpop.permute.xlu1 %649  ;;  %v652_v23 = vpop.permute.xlu0 %651 }
 0x27f   : > { %v660_v24 = vadd.f32 %v650_v22, %v620_v20  ;;  %v661_v25 = vadd.f32 %v652_v23, %v621_v21 }
 0x281   : > { %1078 = vtanh.f32 %v660_v24 }
 0x282   : > { %1080 = vtanh.f32 %v661_v25  ;;  %v654_v27 = vpop.permute.xlu1 %653 }
 0x283   : > { %v662_v28 = vadd.f32 %v654_v27, %v622_v26 }
 0x285   : > { %1082 = vtanh.f32 %v662_v28 }
 0x287   : > { %v1077_v29 = vpop.eup %1076 }
 0x288   : > { %671 = vrot.lane.b32.xlu0 %v1077_v29, %s1309_s9 }
 0x28b   : > { %v1079_v30 = vpop.eup %1078 }
 0x28c   : > { %v1081_v31 = vpop.eup %1080  ;;  %673 = vrot.lane.b32.xlu1 %v1079_v30, %s1309_s9 }
 0x28d   : > { %675 = vrot.lane.b32.xlu0 %v1081_v31, %s1309_s9 }
 0x28f   : > { %v1083_v32 = vpop.eup %1082 }
 0x290   : > { %677 = vrot.lane.b32.xlu1 %v1083_v32, %s1309_s9 }
 0x291   : > { %691 = vrot.lane.b32.xlu0 %v659_v19, %s1311_s10 }
 0x294   : > { %693 = vrot.lane.b32.xlu1 %v660_v24, %s1311_s10 }
 0x2fa   : > { %v672_v33 = vpop.permute.xlu0 %671 }
 0x2fb   : > { %v683_v34 = vmul.f32 %v1069_v1, %v672_v33 }
 0x2fd   : > { %711 = vrot.lane.b32.xlu0 %v683_v34, %s1310_s7 }
 0x2fe   : > { %v674_v35 = vpop.permute.xlu1 %673 }
 0x2ff   : > { %v684_v36 = vmul.f32 %v1071_v4, %v674_v35  ;;  %v676_v37 = vpop.permute.xlu0 %675 }
 0x300   : > { %v685_v38 = vmul.f32 %v1073_v5, %v676_v37 }
 0x301   : > { %713 = vrot.lane.b32.xlu1 %v684_v36, %s1310_s7 }
 0x302   : > { %715 = vrot.lane.b32.xlu0 %v685_v38, %s1310_s7  ;;  %v678_v39 = vpop.permute.xlu1 %677 }
 0x303   : > { %v686_v40 = vmul.f32 %v1075_v10, %v678_v39  ;;  %v692_v41 = vpop.permute.xlu0 %691 }
 0x304   : > { %703 = vst.msk [vmem:[#allocation3] sm:$0xff] %vm369_vm1, %v692_v41 }
 0x305   : > { %717 = vrot.lane.b32.xlu1 %v686_v40, %s1310_s7 }
 0x306   : > { %695 = vrot.lane.b32.xlu0 %v661_v25, %s1311_s10  ;;  %v694_v42 = vpop.permute.xlu1 %693 }
 0x307   : > { %704 = vst.msk [vmem:[#allocation3 + $0x8] sm:$0xff] %vm369_vm1, %v694_v42 }
 0x309   : > { %697 = vrot.lane.b32.xlu1 %v662_v28, %s1311_s10 }
 0x36f   : > { %v712_v43 = vpop.permute.xlu0 %711 }
 0x370   : > { %723 = vst.msk [vmem:[#allocation2] sm:$0xff] %vm369_vm1, %v712_v43  ;;  %727 = vst.msk [vmem:[%s1594_s29] sm:$0xff] %vm369_vm1, %v712_v43 }
 0x373   : > { %v714_v44 = vpop.permute.xlu1 %713 }
 0x374   : > { %724 = vst.msk [vmem:[#allocation2 + $0x8] sm:$0xff] %vm369_vm1, %v714_v44  ;;  %728 = vst.msk [vmem:[%s1594_s29 + $0x8] sm:$0xff] %vm369_vm1, %v714_v44  ;;  %v716_v45 = vpop.permute.xlu0 %715 }
 0x375   : > { %725 = vst.msk [vmem:[#allocation2 + $0x10] sm:$0xff] %vm369_vm1, %v716_v45  ;;  %729 = vst.msk [vmem:[%s1594_s29 + $0x10] sm:$0xff] %vm369_vm1, %v716_v45 }
 0x377   : > { %v718_v46 = vpop.permute.xlu1 %717 }
 0x378   : > { %726 = vst.msk [vmem:[#allocation2 + $0x18] sm:$0xff] %vm369_vm1, %v718_v46  ;;  %730 = vst.msk [vmem:[%s1594_s29 + $0x18] sm:$0xff] %vm369_vm1, %v718_v46  ;;  %v696_v47 = vpop.permute.xlu0 %695 }
 0x379   : > { %705 = vst.msk [vmem:[#allocation3 + $0x10] sm:$0xff] %vm369_vm1, %v696_v47 }
 0x37a   : > { %1239 = shalt.err (!%p1236_p10)
}
 0x37b   : > { %s1240_s29 = scalar_lea.hbm %s1649_s26, 512  ;;  %s1244_s7 = scalar_lea.hbm %s1705_s6, 4096 }
 0x37c   : > { %p1241_p0 = scmp.ne.s32.totalorder %s1649_s26, %s1240_s29  ;;  %p1245_p9 = scmp.lt.u32.totalorder %s1649_s26, %s1705_s6 }
 0x37d   : > { %p1246_p6 = scmp.lt.u32.totalorder %s1244_s7, %s1240_s29  ;;  %p1248_p5 = scmp.lt.u32.totalorder %s1240_s29, %s1649_s26 }
 0x37e   : > { %p1242_p11 = pnand %p1241_p0, %p1521_p8 }
 0x37f   : > { %p1247_p3 = por %p1246_p6, %p1245_p9 }
 0x380   : > { %p1243_p4 = pneg %p1242_p11 }
 0x381   : > { %p1249_p7 = por %p1248_p5, %p1247_p3 }
 0x383   : > { %p1250_p12 = pnand %p1249_p7, %p1243_p4 }
 0x385   : > { %1253 = shalt.err (!%p1250_p12)
}
 0x386   : > { %s1313_s19 = smov 128   ;;  %s1314_s14 = smov 8   ;;  %v698_v48 = vpop.permute.xlu1 %697 }
 0x387   : > { %976 = dma.vmem_to_hbm [thread:$0]  (%p1521_p8), %s1651_s8, 512, %s1649_s26, %s732_s25, %s1313_s19, %s1313_s19, %s1314_s14   ;;  %706 = vst.msk [vmem:[#allocation3 + $0x18] sm:$0xff] %vm369_vm1, %v698_v48 }
 0x388 PF: > { %p1008_p1 = scmp.ge.s32.totalorder %s1300_s24, 2  ;;  %s760_s20 = sand.u32 1, %s1288_s21  }
 0x389   : > { %p1724_p2 = scmp.ne.s32.totalorder %s1710_s28, 0  ;;  %s761_s12 = scalar_lea.sflag [#allocation6], %s760_s20 }
 0x38b   : > { %p996_p13 = pnand %p1008_p1, %p1724_p2 }
 0x38d   : > { %1283 = dma.done.wait (!%p996_p13), %s761_s12, 512  }
 0x38e   : > { %1285 = vsyncadd (!%p996_p13), %s761_s12, 4294966784  ;;  %p21_p8 = scmp.ge.s32.totalorder %s1511_s18, 10   ;;  %s1725_s21 = smov %s1292_s22 }
 0x38f   : > { %s1726_s22 = smov %s1296_s23  ;;  %s1727_s23 = smov %s1527_s16 }
 0x390   : > { %s1728_s24 = smov %s1511_s18  ;;  %23 = sbr.rel (!%p21_p8) target bundleno = 7 (0x7), region = 109 }
 0x397   :  { %766 = vsyncpa [#allocation5], 1 }
 0x398   :  { %768 = vsyncpa [#allocation5 + $0x1], 1 }
 0x399   :  { %769 = vsyncpa [#allocation8], 1 }
 0x39a   :  { %770 = vsyncpa [#allocation11], 1 }
 0x39b   :  { %771 = vsyncpa [#allocation6], 1 }
 0x39c   :  { %773 = vsyncpa [#allocation6 + $0x1], 1 }

</bundles_post_ra>
